<compile_context>
chip_gen: v7x
topology: tpu7x:2x2x1
jax: 0.10.0
libtpu: 0.0.40
codegen_flags: <defaults>
</compile_context>

<pallas_src>
import functools

import jax
import jax.numpy as jnp
from jax import lax
from jax.experimental import pallas as pl
from jax.experimental.pallas import tpu as pltpu

N_BINS = 15
BIN_PAD = 128   # pad the bin axis to one full lane vector
W_ROWS = 8      # [count, conf, acc] rows padded to one sublane group


def _ece_partials_kernel(logits_ref, labels_ref, out_ref, *,
                         tile_n, total_n, n_inner):
    o = pl.program_id(0)          # "parallel" outer axis (<= 2)
    i = pl.program_id(1)          # "arbitrary" inner axis (accumulation)

    @pl.when(i == 0)
    def _():
        out_ref[...] = jnp.zeros_like(out_ref)

    x = logits_ref[...]                                       # (T, C) native dtype
    T, C = x.shape

    # ---- confidence / prediction without materializing softmax -------------
    m = jnp.max(x, axis=-1, keepdims=True)                    # native dtype
    col_ids = lax.broadcasted_iota(jnp.int32, (1, C), 1)
    # first-max tie-break, matching torch.max / argmax
    pred = jnp.min(jnp.where(x == m, col_ids, C), axis=-1, keepdims=True)

    xf = x.astype(jnp.float32)
    mf = m.astype(jnp.float32)
    denom = jnp.sum(jnp.exp(xf - mf), axis=-1, keepdims=True)
    conf = 1.0 / denom                                        # max softmax prob

    labels = labels_ref[...]                                  # (T, 1) int32

    # Rows past the real batch (remainder-tile padding) are masked *before*
    # anything reaches the MXU contraction -> no NaN poisoning.
    row_ids = lax.broadcasted_iota(jnp.int32, (T, 1), 0)
    valid = ((o * n_inner + i) * tile_n + row_ids) < total_n  # (T, 1) bool

    conf = jnp.where(valid, conf, 0.0)
    acc = jnp.where(valid & (pred == labels), 1.0, 0.0)

    # bin b covers (b/15, (b+1)/15]  =>  b = ceil(conf*15) - 1 ; padded rows -> -1
    b = jnp.clip(jnp.ceil(conf * N_BINS).astype(jnp.int32) - 1, 0, N_BINS - 1)
    b = jnp.where(valid, b, -1)

    bin_ids = lax.broadcasted_iota(jnp.int32, (1, BIN_PAD), 1)
    in_bin_f = (bin_ids == b).astype(jnp.float32)             # (T, 128)

    # ---- fuse [count, sum_conf, sum_acc] into one MXU contraction ----------
    wcol = lax.broadcasted_iota(jnp.int32, (1, W_ROWS), 1)
    w = jnp.where(wcol == 0, 1.0,
        jnp.where(wcol == 1, conf,
        jnp.where(wcol == 2, acc, 0.0)))                      # (T, 8)

    out_ref[...] += lax.dot_general(                          # (8, 128)
        w, in_bin_f,
        dimension_numbers=(((0,), (0,)), ((), ())),
        preferred_element_type=jnp.float32)


def _vmem_budget_bytes():
    """Return (usable block budget, scoped VMEM limit) in bytes for this chip."""
    try:
        cap = int(pltpu.get_tpu_info().vmem_capacity_bytes)
    except Exception:
        cap = 0
    if cap <= 0:
        cap = 64 << 20                      # conservative fallback (v7x per-TC VMEM)
    budget = min(int(cap * 0.65), 96 << 20)  # ~41 MiB on v7x, ~83 MiB on v5e/v6e
    limit = int(min(cap, budget + (8 << 20)))
    return budget, limit


def ece_loss(logits, labels, *, tile_n=None):
    """Pallas ECE. logits: (N, C) float (any float dtype), labels: (N,) int.

    Returns shape (1,) float32, matching the PyTorch module's forward.
    """
    N, C = logits.shape
    labels2d = labels.reshape(N, 1).astype(jnp.int32)

    itemsize = jnp.dtype(logits.dtype).itemsize
    pack = {4: 8, 2: 16, 1: 32}.get(itemsize, 8)              # sublane packing

    budget, vmem_limit = _vmem_budget_bytes()

    # Per-row VMEM footprint (double-buffered input blocks + intermediates):
    #   logits block          : 2 * C * itemsize
    #   labels (T,1) int32    : lane-pads to 128 lanes -> 2 * 512 B
    #   f32 cast / exp temps  : ~3 * C * 4
    #   lane-wide temps       : one-hot (T,128), w, misc (T,1) temps ~4 * 512 B
    bytes_per_row = 2 * C * itemsize + 2 * 128 * 4 + 3 * C * 4 + 4 * 128 * 4
    max_rows = max(pack, int(budget // bytes_per_row) // pack * pack)
    # TODO(synk): very large C (big-vocab logits) needs a C-tiled online-softmax
    # inner loop; here we only clamp the row tile and raise the scoped VMEM limit.

    if tile_n is None:
        # Size the tile by bytes: aim for a ~4 MiB logits block per grid step.
        tile_n = max(pack, (4 << 20) // max(1, C * itemsize))
    tile_n = min(int(tile_n), max_rows)
    tile_n = max(pack, (tile_n // pack) * pack)
    if tile_n >= N:
        tile_n = N                  # single full-extent block (always legal)

    grid_n = pl.cdiv(N, tile_n)
    n_outer = 2 if grid_n >= 4 else 1       # lets v7x shard across both TCs
    n_inner = pl.cdiv(grid_n, n_outer)

    def row_block(o, i):
        # Clamp so the (rare) overshoot step of an odd grid re-reads the last
        # block; its rows are masked out inside the kernel.
        return (jnp.minimum(o * n_inner + i, grid_n - 1), 0)

    partials = pl.pallas_call(
        functools.partial(_ece_partials_kernel, tile_n=tile_n, total_n=N,
                          n_inner=n_inner),
        out_shape=jax.ShapeDtypeStruct((n_outer, W_ROWS, BIN_PAD), jnp.float32),
        grid_spec=pltpu.PrefetchScalarGridSpec(
            num_scalar_prefetch=0,
            grid=(n_outer, n_inner),
            in_specs=[
                pl.BlockSpec((tile_n, C), row_block),
                pl.BlockSpec((tile_n, 1), row_block),
            ],
            out_specs=pl.BlockSpec((None, W_ROWS, BIN_PAD),
                                   lambda o, i: (o, 0, 0)),
        ),
        compiler_params=pltpu.CompilerParams(
            dimension_semantics=("parallel", "arbitrary"),
            vmem_limit_bytes=vmem_limit),
    )(logits, labels2d)

    # Tiny epilogue over the 15 bins and the (<= 2) per-core partials.
    cnt = jnp.sum(partials[:, 0, :N_BINS], axis=0)
    conf_sum = jnp.sum(partials[:, 1, :N_BINS], axis=0)
    acc_sum = jnp.sum(partials[:, 2, :N_BINS], axis=0)

    prop = cnt / jnp.float32(N)
    safe = jnp.where(cnt > 0, cnt, 1.0)
    per_bin = jnp.where(cnt > 0,
                        jnp.abs(conf_sum / safe - acc_sum / safe) * prop,
                        0.0)
    return jnp.sum(per_bin).reshape(1)


def ece_ref(logits, labels, n_bins=N_BINS):
    """Pure-JAX reference mirroring the PyTorch module."""
    probs = jax.nn.softmax(logits.astype(jnp.float32), axis=-1)
    conf = jnp.max(probs, axis=-1)
    pred = jnp.argmax(probs, axis=-1)
    acc = (pred == labels).astype(jnp.float32)
    bounds = jnp.linspace(0.0, 1.0, n_bins + 1)
    ece = jnp.zeros((1,), jnp.float32)
    for b in range(n_bins):
        in_bin = (conf > bounds[b]) & (conf <= bounds[b + 1])
        prop = jnp.mean(in_bin.astype(jnp.float32))
        cnt = jnp.sum(in_bin.astype(jnp.float32))
        safe = jnp.where(cnt > 0, cnt, 1.0)
        avg_acc = jnp.sum(jnp.where(in_bin, acc, 0.0)) / safe
        avg_conf = jnp.sum(jnp.where(in_bin, conf, 0.0)) / safe
        ece = ece + jnp.where(cnt > 0, jnp.abs(avg_conf - avg_acc) * prop, 0.0)
    return ece


if __name__ == "__main__":
    key = jax.random.PRNGKey(0)
    k1, k2 = jax.random.split(key)

    N, C = 128, 16  # small synthetic problem: 128 samples, 16 classes
    logits = jax.random.normal(k1, (N, C), dtype=jnp.float32) * 2.0
    labels = jax.random.randint(k2, (N,), 0, C, dtype=jnp.int32)

    ref = ece_ref(logits, labels)

    # 1) default byte-sized tiling (single full block at this tiny size)
    ece = ece_loss(logits, labels)
    jax.block_until_ready(ece)
    assert jnp.allclose(ece, ref, atol=1e-5, rtol=1e-5), (ece, ref)

    # 2) forced small tiles -> multi-step path with a masked remainder tile
    ece_multi = ece_loss(logits, labels, tile_n=48)
    jax.block_until_ready(ece_multi)
    assert jnp.allclose(ece_multi, ref, atol=1e-5, rtol=1e-5), (ece_multi, ref)

    # 3) even smaller tiles -> exercises the 2-way "parallel" outer axis
    ece_split = ece_loss(logits, labels, tile_n=16)
    jax.block_until_ready(ece_split)
    assert jnp.allclose(ece_split, ref, atol=1e-5, rtol=1e-5), (ece_split, ref)

    # 4) bf16 logits streamed in native dtype (exp / sums still in f32)
    logits_bf16 = logits.astype(jnp.bfloat16)
    ref_bf16 = ece_ref(logits_bf16, labels)
    ece_bf16 = ece_loss(logits_bf16, labels, tile_n=48)
    jax.block_until_ready(ece_bf16)
    assert jnp.allclose(ece_bf16, ref_bf16, atol=1e-4, rtol=1e-4), (ece_bf16, ref_bf16)

    print("KERNEL_OK")
</pallas_src>

<mosaic_0001>
module attributes {stable_mosaic.version = 11 : i64} {
  func.func @_ece_partials_kernel(%arg0: i32, %arg1: i32, %arg2: memref<128x16xf32, #tpu.memory_space<vmem>>, %arg3: memref<128x1xi32, #tpu.memory_space<vmem>>, %arg4: memref<1x8x128xf32, #tpu.memory_space<vmem>>) attributes {dimension_semantics = [#tpu.dimension_semantics<parallel>, #tpu.dimension_semantics<arbitrary>], iteration_bounds = array<i64: 1, 1>, scalar_prefetch = 0 : i64, scratch_operands = 0 : i64, tpu.core_type = #tpu.core_type<tc>, window_params = [{transform_indices = @transform_0, window_bounds = array<i64: 128, 16>}, {transform_indices = @transform_1, window_bounds = array<i64: 128, 1>}, {transform_indices = @transform_2, window_bounds = array<i64: 1, 8, 128>}]} {
    %c0_i32 = arith.constant 0 : i32
    %0 = arith.cmpi eq, %arg1, %c0_i32 : i32
    %1 = arith.extui %0 : i1 to i32
    %c0_i32_0 = arith.constant 0 : i32
    %2 = arith.cmpi ne, %1, %c0_i32_0 : i32
    scf.if %2 {
      %cst_25 = arith.constant 0.000000e+00 : f32
      %85 = vector.broadcast %cst_25 : f32 to vector<8x128xf32>
      %c0_26 = arith.constant 0 : index
      %c0_27 = arith.constant 0 : index
      %c0_28 = arith.constant 0 : index
      %86 = vector.load %arg4[%c0_26, %c0_27, %c0_28] : memref<1x8x128xf32, #tpu.memory_space<vmem>>, vector<1x8x128xf32>
      %87 = vector.shape_cast %86 : vector<1x8x128xf32> to vector<8x128xf32>
      %88 = vector.shape_cast %85 : vector<8x128xf32> to vector<1x8x128xf32>
      tpu.vector_store %arg4[%c0_26, %c0_27, %c0_28], %88 {strides = array<i32>} : memref<1x8x128xf32, #tpu.memory_space<vmem>>, vector<1x8x128xf32>,
    } else {
    }
    %c0 = arith.constant 0 : index
    %c0_1 = arith.constant 0 : index
    %3 = vector.load %arg2[%c0, %c0_1] : memref<128x16xf32, #tpu.memory_space<vmem>>, vector<128x16xf32>
    %cst = arith.constant dense<0xFF800000> : vector<128xf32>
    %4 = vector.multi_reduction <maximumf>, %3, %cst [1] : vector<128x16xf32> to vector<128xf32>
    %5 = vector.shape_cast %4 : vector<128xf32> to vector<128x1xf32>
    %6 = tpu.iota {dimensions = array<i32: 1>} : vector<1x16xi32>
    %7 = vector.broadcast %5 : vector<128x1xf32> to vector<128x16xf32>
    %8 = arith.cmpf oeq, %3, %7 : vector<128x16xf32>
    %c16_i32 = arith.constant 16 : i32
    %9 = vector.shape_cast %6 : vector<1x16xi32> to vector<1x16xi32>
    %10 = vector.broadcast %9 : vector<1x16xi32> to vector<128x16xi32>
    %11 = vector.broadcast %c16_i32 : i32 to vector<128x16xi32>
    %12 = arith.select %8, %10, %11 : vector<128x16xi1>, vector<128x16xi32>
    %cst_2 = arith.constant dense<2147483647> : vector<128xi32>
    %13 = vector.multi_reduction <minsi>, %12, %cst_2 [1] : vector<128x16xi32> to vector<128xi32>
    %14 = vector.shape_cast %13 : vector<128xi32> to vector<128x1xi32>
    %15 = vector.broadcast %5 : vector<128x1xf32> to vector<128x16xf32>
    %16 = arith.subf %3, %15 : vector<128x16xf32>
    %17 = math.exp %16 : vector<128x16xf32>
    %cst_3 = arith.constant dense<0.000000e+00> : vector<128xf32>
    %18 = vector.multi_reduction <add>, %17, %cst_3 [1] : vector<128x16xf32> to vector<128xf32>
    %19 = vector.shape_cast %18 : vector<128xf32> to vector<128x1xf32>
    %cst_4 = arith.constant 1.000000e+00 : f32
    %20 = vector.broadcast %cst_4 : f32 to vector<128x1xf32>
    %21 = arith.divf %20, %19 : vector<128x1xf32>
    %c0_5 = arith.constant 0 : index
    %c0_6 = arith.constant 0 : index
    %22 = vector.load %arg3[%c0_5, %c0_6] : memref<128x1xi32, #tpu.memory_space<vmem>>, vector<128x1xi32>
    %23 = tpu.iota {dimensions = array<i32: 0>} : vector<128x1xi32>
    %c1_i32 = arith.constant 1 : i32
    %24 = arith.muli %arg0, %c1_i32 : i32
    %25 = arith.addi %24, %arg1 : i32
    %c128_i32 = arith.constant 128 : i32
    %26 = arith.muli %25, %c128_i32 : i32
    %27 = vector.broadcast %26 : i32 to vector<128x1xi32>
    %28 = arith.addi %27, %23 : vector<128x1xi32>
    %c128_i32_7 = arith.constant 128 : i32
    %29 = vector.broadcast %c128_i32_7 : i32 to vector<128x1xi32>
    %30 = arith.cmpi slt, %28, %29 : vector<128x1xi32>
    %cst_8 = arith.constant 0.000000e+00 : f32
    %31 = vector.broadcast %cst_8 : f32 to vector<128x1xf32>
    %32 = arith.select %30, %21, %31 : vector<128x1xi1>, vector<128x1xf32>
    %33 = arith.cmpi eq, %14, %22 : vector<128x1xi32>
    %34 = arith.andi %30, %33 : vector<128x1xi1>
    %cst_9 = arith.constant 1.000000e+00 : f32
    %cst_10 = arith.constant 0.000000e+00 : f32
    %35 = vector.broadcast %cst_9 : f32 to vector<128x1xf32>
    %36 = vector.broadcast %cst_10 : f32 to vector<128x1xf32>
    %37 = arith.select %34, %35, %36 : vector<128x1xi1>, vector<128x1xf32>
    %cst_11 = arith.constant 1.500000e+01 : f32
    %38 = vector.broadcast %cst_11 : f32 to vector<128x1xf32>
    %39 = arith.mulf %32, %38 : vector<128x1xf32>
    %40 = math.ceil %39 : vector<128x1xf32>
    %41 = arith.fptosi %40 : vector<128x1xf32> to vector<128x1xi32>
    %c1_i32_12 = arith.constant 1 : i32
    %42 = vector.broadcast %c1_i32_12 : i32 to vector<128x1xi32>
    %43 = arith.subi %41, %42 : vector<128x1xi32>
    %c0_i32_13 = arith.constant 0 : i32
    %c14_i32 = arith.constant 14 : i32
    %44 = vector.broadcast %c0_i32_13 : i32 to vector<128x1xi32>
    %45 = arith.maxsi %44, %43 : vector<128x1xi32>
    %46 = vector.broadcast %c14_i32 : i32 to vector<128x1xi32>
    %47 = arith.minsi %46, %45 : vector<128x1xi32>
    %c-1_i32 = arith.constant -1 : i32
    %48 = vector.broadcast %c-1_i32 : i32 to vector<128x1xi32>
    %49 = arith.select %30, %47, %48 : vector<128x1xi1>, vector<128x1xi32>
    %50 = tpu.iota {dimensions = array<i32: 1>} : vector<1x128xi32>
    %51 = vector.broadcast %50 : vector<1x128xi32> to vector<128x128xi32>
    %52 = vector.broadcast %49 : vector<128x1xi32> to vector<128x128xi32>
    %53 = arith.cmpi eq, %51, %52 : vector<128x128xi32>
    %54 = arith.extui %53 : vector<128x128xi1> to vector<128x128xi32>
    %55 = arith.sitofp %54 : vector<128x128xi32> to vector<128x128xf32>
    %56 = tpu.iota {dimensions = array<i32: 1>} : vector<1x8xi32>
    %c0_i32_14 = arith.constant 0 : i32
    %57 = vector.broadcast %c0_i32_14 : i32 to vector<1x8xi32>
    %58 = arith.cmpi eq, %56, %57 : vector<1x8xi32>
    %c1_i32_15 = arith.constant 1 : i32
    %59 = vector.broadcast %c1_i32_15 : i32 to vector<1x8xi32>
    %60 = arith.cmpi eq, %56, %59 : vector<1x8xi32>
    %c2_i32 = arith.constant 2 : i32
    %61 = vector.broadcast %c2_i32 : i32 to vector<1x8xi32>
    %62 = arith.cmpi eq, %56, %61 : vector<1x8xi32>
    %cst_16 = arith.constant 0.000000e+00 : f32
    %63 = vector.shape_cast %62 : vector<1x8xi1> to vector<1x8xi1>
    %64 = vector.broadcast %63 : vector<1x8xi1> to vector<128x8xi1>
    %65 = vector.shape_cast %37 : vector<128x1xf32> to vector<128x1xf32>
    %66 = vector.broadcast %65 : vector<128x1xf32> to vector<128x8xf32>
    %67 = vector.broadcast %cst_16 : f32 to vector<128x8xf32>
    %68 = arith.select %64, %66, %67 : vector<128x8xi1>, vector<128x8xf32>
    %69 = vector.shape_cast %60 : vector<1x8xi1> to vector<1x8xi1>
    %70 = vector.broadcast %69 : vector<1x8xi1> to vector<128x8xi1>
    %71 = vector.shape_cast %32 : vector<128x1xf32> to vector<128x1xf32>
    %72 = vector.broadcast %71 : vector<128x1xf32> to vector<128x8xf32>
    %73 = arith.select %70, %72, %68 : vector<128x8xi1>, vector<128x8xf32>
    %cst_17 = arith.constant 1.000000e+00 : f32
    %74 = vector.shape_cast %58 : vector<1x8xi1> to vector<1x8xi1>
    %75 = vector.broadcast %74 : vector<1x8xi1> to vector<128x8xi1>
    %76 = vector.broadcast %cst_17 : f32 to vector<128x8xf32>
    %77 = arith.select %75, %76, %73 : vector<128x8xi1>, vector<128x8xf32>
    %c0_18 = arith.constant 0 : index
    %c0_19 = arith.constant 0 : index
    %c0_20 = arith.constant 0 : index
    %78 = vector.load %arg4[%c0_18, %c0_19, %c0_20] : memref<1x8x128xf32, #tpu.memory_space<vmem>>, vector<1x8x128xf32>
    %79 = vector.shape_cast %78 : vector<1x8x128xf32> to vector<8x128xf32>
    %cst_21 = arith.constant dense<0.000000e+00> : vector<8x128xf32>
    %80 = tpu.matmul %77, %55, %cst_21 {dimension_numbers = #tpu.dot_dimension_numbers<[0], [0], [1], [1], [0, 1, 1, 1], [], []>} : vector<128x8xf32>, vector<128x128xf32>, vector<8x128xf32> -> vector<8x128xf32>
    %81 = arith.addf %79, %80 : vector<8x128xf32>
    %c0_22 = arith.constant 0 : index
    %c0_23 = arith.constant 0 : index
    %c0_24 = arith.constant 0 : index
    %82 = vector.load %arg4[%c0_22, %c0_23, %c0_24] : memref<1x8x128xf32, #tpu.memory_space<vmem>>, vector<1x8x128xf32>
    %83 = vector.shape_cast %82 : vector<1x8x128xf32> to vector<8x128xf32>
    %84 = vector.shape_cast %81 : vector<8x128xf32> to vector<1x8x128xf32>
    tpu.vector_store %arg4[%c0_22, %c0_23, %c0_24], %84 {strides = array<i32>} : memref<1x8x128xf32, #tpu.memory_space<vmem>>, vector<1x8x128xf32>,
    return
  }
  func.func @transform_0(%arg0: i32, %arg1: i32) -> (i32, i32) {
    %c1_i32 = arith.constant 1 : i32
    %0 = arith.muli %arg0, %c1_i32 : i32
    %1 = arith.addi %0, %arg1 : i32
    %c0_i32 = arith.constant 0 : i32
    %2 = arith.minsi %1, %c0_i32 : i32
    %c0_i32_0 = arith.constant 0 : i32
    %c0_i32_1 = arith.constant 0 : i32
    return %2, %c0_i32_0 : i32, i32
  }
  func.func @transform_1(%arg0: i32, %arg1: i32) -> (i32, i32) {
    %c1_i32 = arith.constant 1 : i32
    %0 = arith.muli %arg0, %c1_i32 : i32
    %1 = arith.addi %0, %arg1 : i32
    %c0_i32 = arith.constant 0 : i32
    %2 = arith.minsi %1, %c0_i32 : i32
    %c0_i32_0 = arith.constant 0 : i32
    %c0_i32_1 = arith.constant 0 : i32
    return %2, %c0_i32_0 : i32, i32
  }
  func.func @transform_2(%arg0: i32, %arg1: i32) -> (i32, i32, i32) {
    %c0_i32 = arith.constant 0 : i32
    %c0_i32_0 = arith.constant 0 : i32
    %c0_i32_1 = arith.constant 0 : i32
    return %arg0, %c0_i32, %c0_i32_0 : i32, i32, i32
  }
}

</mosaic_0001>

<bundles_post_ra>
// kernel: tpu_custom_call.1
= control target key start
LH: loop header
LB: loop body
LE: loop exit
PB: predicated region body
PF: predicated region fallthrough
CT: control target
= control target key end

     0   :  { %vm97_vm0 = vcmask 130048   ;;  %s2158_s0 = inlined_call_operand.vmem [shape: f32[128,16], index: 0, kind: input, shape index: {}]   ;;  %s2159_s1 = inlined_call_operand.vmem [shape: s32[128,1], index: 1, kind: input, shape index: {}]   ;;  %s2160_s2 = inlined_call_operand.hbm [shape: f32[1,8,128], index: 2, kind: output, shape index: {}]  }
   0x1   :  { %v1437_v0 = vld [vmem:[%s2158_s0] sm:$0xff]  ;;  %v1442_v1 = vld [vmem:[%s2158_s0 + $0x10] sm:$0xff]  ;;  %v1447_v2 = vld [vmem:[%s2158_s0 + $0x8] sm:$0xff] }
   0x2   :  { %v98_v3 = vsel %vm97_vm0, %v1437_v0, -inf  ;;  %v104_v4 = vsel %vm97_vm0, %v1442_v1, -inf  ;;  %v1456_v5 = vld [vmem:[%s2158_s0 + $0x18] sm:$0xff]  ;;  %v101_v6 = vsel %vm97_vm0, %v1447_v2, -inf  ;;  %v1465_v8 = vld [vmem:[%s2158_s0 + $0x20] sm:$0xff]  ;;  %v1470_v9 = vld [vmem:[%s2158_s0 + $0x28] sm:$0xff] }
   0x3   :  { %99 = vmax.xlane.f32.xlu0 %v98_v3  ;;  %105 = vmax.xlane.f32.xlu1 %v104_v4  ;;  %v107_v7 = vsel %vm97_vm0, %v1456_v5, -inf }
   0x7   :  { %102 = vmax.xlane.f32.xlu0 %v101_v6  ;;  %108 = vmax.xlane.f32.xlu1 %v107_v7 }
   0x8   :  { %7 = vsyncpa [#allocation3], 0  ;;  %v110_v10 = vsel %vm97_vm0, %v1465_v8, -inf  ;;  %v113_v11 = vsel %vm97_vm0, %v1470_v9, -inf  ;;  %v1479_v12 = vld [vmem:[%s2158_s0 + $0x30] sm:$0xff]  ;;  %v1484_v13 = vld [vmem:[%s2158_s0 + $0x38] sm:$0xff]  ;;  %v146_v32 = vlaneseq }
   0x9   :  { %v116_v14 = vsel %vm97_vm0, %v1479_v12, -inf  ;;  %v119_v15 = vsel %vm97_vm0, %v1484_v13, -inf  ;;  %v1493_v16 = vld [vmem:[%s2158_s0 + $0x40] sm:$0xff]  ;;  %v1498_v17 = vld [vmem:[%s2158_s0 + $0x48] sm:$0xff]  ;;  %v1507_v20 = vld [vmem:[%s2158_s0 + $0x50] sm:$0xff] }
   0xa   :  { %v122_v18 = vsel %vm97_vm0, %v1493_v16, -inf  ;;  %v125_v19 = vsel %vm97_vm0, %v1498_v17, -inf  ;;  %v1512_v21 = vld [vmem:[%s2158_s0 + $0x58] sm:$0xff]  ;;  %v128_v22 = vsel %vm97_vm0, %v1507_v20, -inf  ;;  %v1521_v24 = vld [vmem:[%s2158_s0 + $0x60] sm:$0xff]  ;;  %v1526_v25 = vld [vmem:[%s2158_s0 + $0x68] sm:$0xff] }
   0xb   :  { %111 = vmax.xlane.f32.xlu0 %v110_v10  ;;  %114 = vmax.xlane.f32.xlu1 %v113_v11  ;;  %v131_v23 = vsel %vm97_vm0, %v1512_v21, -inf  ;;  %v134_v26 = vsel %vm97_vm0, %v1521_v24, -inf  ;;  %v137_v27 = vsel %vm97_vm0, %v1526_v25, -inf  ;;  %v1535_v28 = vld [vmem:[%s2158_s0 + $0x70] sm:$0xff]  ;;  %v1540_v29 = vld [vmem:[%s2158_s0 + $0x78] sm:$0xff]  ;;  %v1546_v33 = vand.u32 127, %v146_v32 }
   0xc   :  { %v140_v30 = vsel %vm97_vm0, %v1535_v28, -inf  ;;  %v143_v31 = vsel %vm97_vm0, %v1540_v29, -inf }
   0xf   :  { %117 = vmax.xlane.f32.xlu0 %v116_v14  ;;  %120 = vmax.xlane.f32.xlu1 %v119_v15 }
  0x13   :  { %123 = vmax.xlane.f32.xlu0 %v122_v18  ;;  %126 = vmax.xlane.f32.xlu1 %v125_v19 }
  0x17   :  { %129 = vmax.xlane.f32.xlu0 %v128_v22  ;;  %132 = vmax.xlane.f32.xlu1 %v131_v23 }
  0x1b   :  { %135 = vmax.xlane.f32.xlu0 %v134_v26  ;;  %138 = vmax.xlane.f32.xlu1 %v137_v27 }
  0x1f   :  { %141 = vmax.xlane.f32.xlu0 %v140_v30  ;;  %144 = vmax.xlane.f32.xlu1 %v143_v31 }
  0x90   :  { %v1548_v34 = vpop.xlane.xlu0 %99  ;;  %v1550_v35 = vpop.xlane.xlu1 %105 }
  0x91   :  { %vm148_vm1 = vcmp.eq.f32.partialorder %v1437_v0, %v1548_v34  ;;  %vm150_vm2 = vcmp.eq.f32.partialorder %v1442_v1, %v1550_v35  ;;  %v420_v22 = vsub.f32 %v1437_v0, %v1548_v34  ;;  %v422_v0 = vsub.f32 %v1442_v1, %v1550_v35 }
  0x92   :  { %v164_v36 = vsel %vm148_vm1, %v1546_v33, 16  ;;  %v166_v37 = vsel %vm150_vm2, %v1546_v33, 16 }
  0x93   :  { %v1559_v38 = vsel %vm97_vm0, %v164_v36, 2147483647  ;;  %v1567_v42 = vsel %vm97_vm0, %v166_v37, 2147483647 }
  0x94   :  { %v1561_v39 = vpop.xlane.xlu0 %102  ;;  %v1563_v40 = vpop.xlane.xlu1 %108  ;;  %v182_v41 = vshra.s32 %v1559_v38, 16  ;;  %v212_v46 = vshra.s32 %v1567_v42, 16 }
  0x95   :  { %vm149_vm3 = vcmp.eq.f32.partialorder %v1447_v2, %v1561_v39  ;;  %vm151_vm4 = vcmp.eq.f32.partialorder %v1456_v5, %v1563_v40  ;;  %v421_v36 = vsub.f32 %v1447_v2, %v1561_v39  ;;  %v440_v39 = vmul.f32 1.442695, %v422_v0 }
  0x96   :  { %v165_v43 = vsel %vm149_vm3, %v1546_v33, 16  ;;  %v167_v44 = vsel %vm151_vm4, %v1546_v33, 16  ;;  %v1575_v45 = vcvt.s32.f32 %v182_v41  ;;  %v1596_v54 = vcvt.s32.f32 %v212_v46 }
  0x97   :  { %v1579_v47 = vsel %vm97_vm0, %v165_v43, 2147483647  ;;  %v1587_v51 = vsel %vm97_vm0, %v167_v44, 2147483647  ;;  %v436_v43 = vmul.f32 1.442695, %v420_v22 }
  0x98   :  { %v1581_v48 = vpop.xlane.xlu0 %111  ;;  %v1583_v49 = vpop.xlane.xlu1 %114  ;;  %v197_v50 = vshra.s32 %v1579_v47, 16  ;;  %185 = vmin.xlane.f32.xlu0 %v1575_v45  ;;  %v227_v56 = vshra.s32 %v1587_v51, 16 }
  0x99   :  { %vm152_vm5 = vcmp.eq.f32.partialorder %v1465_v8, %v1581_v48  ;;  %vm153_vm6 = vcmp.eq.f32.partialorder %v1470_v9, %v1583_v49  ;;  %1324 = vpow2.f32 %v436_v43 }
  0x9a   :  { %v168_v52 = vsel %vm152_vm5, %v1546_v33, 16  ;;  %v169_v53 = vsel %vm153_vm6, %v1546_v33, 16  ;;  %v1598_v55 = vcvt.s32.f32 %v197_v50  ;;  %v1619_v63 = vcvt.s32.f32 %v227_v56 }
  0x9b   :  { %v1606_v59 = vsel %vm97_vm0, %v168_v52, 2147483647  ;;  %v1609_v60 = vsel %vm97_vm0, %v169_v53, 2147483647  ;;  %v423_v52 = vsub.f32 %v1456_v5, %v1563_v40  ;;  %v438_v56 = vmul.f32 1.442695, %v421_v36 }
  0x9c   :  { %v1601_v57 = vpop.xlane.xlu0 %117  ;;  %v1603_v58 = vpop.xlane.xlu1 %120  ;;  %215 = vmin.xlane.f32.xlu0 %v1596_v54  ;;  %200 = vmin.xlane.f32.xlu1 %v1598_v55  ;;  %v242_v3 = vshra.s32 %v1606_v59, 16  ;;  %v257_v4 = vshra.s32 %v1609_v60, 16  ;;  %1326 = vpow2.f32 %v440_v39 }
  0x9d   :  { %vm154_vm7 = vcmp.eq.f32.partialorder %v1479_v12, %v1601_v57  ;;  %vm155_vm8 = vcmp.eq.f32.partialorder %v1484_v13, %v1603_v58  ;;  %1328 = vpow2.f32 %v438_v56 }
  0x9e   :  { %v170_v61 = vsel %vm154_vm7, %v1546_v33, 16  ;;  %v171_v62 = vsel %vm155_vm8, %v1546_v33, 16  ;;  %v1631_v11 = vcvt.s32.f32 %v242_v3  ;;  %v1642_v18 = vcvt.s32.f32 %v257_v4 }
  0x9f   :  { %v1628_v10 = vsel %vm97_vm0, %v170_v61, 2147483647  ;;  %v1636_v14 = vsel %vm97_vm0, %v171_v62, 2147483647  ;;  %v424_v3 = vsub.f32 %v1465_v8, %v1581_v48  ;;  %v442_v8 = vmul.f32 1.442695, %v423_v52 }
  0xa0   :  { %v1623_v6 = vpop.xlane.xlu0 %123  ;;  %v1625_v7 = vpop.xlane.xlu1 %126  ;;  %230 = vmin.xlane.f32.xlu1 %v1619_v63  ;;  %245 = vmin.xlane.f32.xlu0 %v1631_v11  ;;  %v272_v19 = vshra.s32 %v1628_v10, 16  ;;  %v287_v27 = vshra.s32 %v1636_v14, 16 }
  0xa1   :  { %vm156_vm9 = vcmp.eq.f32.partialorder %v1493_v16, %v1623_v6  ;;  %vm157_vm10 = vcmp.eq.f32.partialorder %v1498_v17, %v1625_v7  ;;  %v444_v36 = vmul.f32 1.442695, %v424_v3  ;;  %1330 = vpow2.f32 %v442_v8 }
  0xa2   :  { %v172_v15 = vsel %vm156_vm9, %v1546_v33, 16  ;;  %v173_v31 = vsel %vm157_vm10, %v1546_v33, 16  ;;  %v1657_v32 = vcvt.s32.f32 %v272_v19  ;;  %v1669_v37 = vcvt.s32.f32 %v287_v27 }
  0xa3   :  { %v1653_v30 = vsel %vm97_vm0, %v172_v15, 2147483647  ;;  %v1677_v1 = vsel %vm97_vm0, %v173_v31, 2147483647  ;;  %1332 = vpow2.f32 %v444_v36 }
  0xa4   :  { %v1647_v23 = vpop.xlane.xlu0 %129  ;;  %v1649_v26 = vpop.xlane.xlu1 %132  ;;  %260 = vmin.xlane.f32.xlu1 %v1642_v18  ;;  %275 = vmin.xlane.f32.xlu0 %v1657_v32  ;;  %v302_v41 = vshra.s32 %v1653_v30, 16  ;;  %v317_v61 = vshra.s32 %v1677_v1, 16 }
  0xa5   :  { %vm158_vm11 = vcmp.eq.f32.partialorder %v1507_v20, %v1647_v23  ;;  %vm159_vm12 = vcmp.eq.f32.partialorder %v1512_v21, %v1649_v26 }
  0xa6   :  { %v174_v34 = vsel %vm158_vm11, %v1546_v33, 16  ;;  %v175_v50 = vsel %vm159_vm12, %v1546_v33, 16  ;;  %v1684_v2 = vcvt.s32.f32 %v302_v41  ;;  %v1709_v22 = vcvt.s32.f32 %v317_v61 }
  0xa7   :  { %v1680_v35 = vsel %vm97_vm0, %v174_v34, 2147483647  ;;  %v1703_v5 = vsel %vm97_vm0, %v175_v50, 2147483647  ;;  %v425_v41 = vsub.f32 %v1470_v9, %v1583_v49  ;;  %v426_v50 = vsub.f32 %v1479_v12, %v1601_v57 }
  0xa8   :  { %v1672_v44 = vpop.xlane.xlu0 %135  ;;  %v1674_v46 = vpop.xlane.xlu1 %138  ;;  %290 = vmin.xlane.f32.xlu1 %v1669_v37  ;;  %305 = vmin.xlane.f32.xlu0 %v1684_v2  ;;  %v332_v62 = vshra.s32 %v1680_v35, 16  ;;  %v347_v0 = vshra.s32 %v1703_v5, 16  ;;  %v428_v9 = vsub.f32 %v1493_v16, %v1623_v6  ;;  %v429_v16 = vsub.f32 %v1498_v17, %v1625_v7 }
  0xa9   :  { %vm160_vm13 = vcmp.eq.f32.partialorder %v1521_v24, %v1672_v44  ;;  %vm161_vm14 = vcmp.eq.f32.partialorder %v1526_v25, %v1674_v46  ;;  %v446_v57 = vmul.f32 1.442695, %v425_v41  ;;  %v1325_v6 = vpop.eup %1324  ;;  %v430_v17 = vsub.f32 %v1507_v20, %v1647_v23 }
  0xaa   :  { %v176_v53 = vsel %vm160_vm13, %v1546_v33, 16  ;;  %v177_v19 = vsel %vm161_vm14, %v1546_v33, 16  ;;  %v1711_v27 = vcvt.s32.f32 %v332_v62  ;;  %v1733_v39 = vcvt.s32.f32 %v347_v0  ;;  %v1327_v0 = vpop.eup %1326 }
  0xab   :  { %v1706_v40 = vsel %vm97_vm0, %v176_v53, 2147483647  ;;  %v1726_v43 = vsel %vm97_vm0, %v177_v19, 2147483647  ;;  %v427_v62 = vsub.f32 %v1484_v13, %v1603_v58  ;;  %v448_v19 = vmul.f32 1.442695, %v426_v50  ;;  %v1329_v58 = vpop.eup %1328 }
  0xac   :  { %v1698_v4 = vpop.xlane.xlu0 %141  ;;  %v1700_v15 = vpop.xlane.xlu1 %144  ;;  %320 = vmin.xlane.f32.xlu1 %v1709_v22  ;;  %335 = vmin.xlane.f32.xlu0 %v1711_v27  ;;  %v362_v34 = vshra.s32 %v1706_v40, 16  ;;  %v377_v53 = vshra.s32 %v1726_v43, 16  ;;  %1334 = vpow2.f32 %v446_v57  ;;  %v468_v7 = vsel %vm97_vm0, %v1325_v6, 0.0 }
  0xad   :  { %vm162_vm15 = vcmp.eq.f32.partialorder %v1535_v28, %v1698_v4  ;;  %vm163_vm1 = vcmp.eq.f32.partialorder %v1540_v29, %v1700_v15  ;;  %v450_v13 = vmul.f32 1.442695, %v427_v62  ;;  %1336 = vpow2.f32 %v448_v19 }
  0xae   :  { %v178_v48 = vsel %vm162_vm15, %v1546_v33, 16  ;;  %v179_v31 = vsel %vm163_vm1, %v1546_v33, 16  ;;  %v1735_v52 = vcvt.s32.f32 %v362_v34  ;;  %v1746_v49 = vcvt.s32.f32 %v377_v53 }
  0xaf   :  { %v1729_v29 = vsel %vm97_vm0, %v178_v48, 2147483647  ;;  %v1740_v61 = vsel %vm97_vm0, %v179_v31, 2147483647  ;;  %v452_v48 = vmul.f32 1.442695, %v428_v9  ;;  %v431_v31 = vsub.f32 %v1512_v21, %v1649_v26  ;;  %v1331_v26 = vpop.eup %1330 }
  0xb0   :  { %v392_v56 = vshra.s32 %v1729_v29, 16  ;;  %350 = vmin.xlane.f32.xlu1 %v1733_v39  ;;  %365 = vmin.xlane.f32.xlu0 %v1735_v52  ;;  %v407_v12 = vshra.s32 %v1740_v61, 16  ;;  %v454_v34 = vmul.f32 1.442695, %v429_v16  ;;  %v432_v21 = vsub.f32 %v1521_v24, %v1672_v44  ;;  %v1333_v23 = vpop.eup %1332 }
  0xb1   :  { %1338 = vpow2.f32 %v452_v48  ;;  %v458_v36 = vmul.f32 1.442695, %v431_v31  ;;  %v456_v41 = vmul.f32 1.442695, %v430_v17  ;;  %v433_v50 = vsub.f32 %v1526_v25, %v1674_v46 }
  0xb2   :  { %v1751_v3 = vcvt.s32.f32 %v392_v56  ;;  %v1759_v8 = vcvt.s32.f32 %v407_v12  ;;  %1340 = vpow2.f32 %v450_v13  ;;  %v471_v53 = vsel %vm97_vm0, %v1329_v58, 0.0 }
  0xb3   :  { %1342 = vpow2.f32 %v454_v34  ;;  %v474_v20 = vsel %vm97_vm0, %v1327_v0, 0.0  ;;  %v460_v56 = vmul.f32 1.442695, %v432_v21  ;;  %v434_v24 = vsub.f32 %v1535_v28, %v1698_v4 }
  0xb4   :  { %380 = vmin.xlane.f32.xlu1 %v1746_v49  ;;  %395 = vmin.xlane.f32.xlu0 %v1751_v3  ;;  %1344 = vpow2.f32 %v458_v36  ;;  %v462_v9 = vmul.f32 1.442695, %v433_v50  ;;  %v477_v12 = vsel %vm97_vm0, %v1331_v26, 0.0  ;;  %v480_v57 = vsel %vm97_vm0, %v1333_v23, 0.0 }
  0xb5   :  { %1346 = vpow2.f32 %v456_v41  ;;  %v464_v46 = vmul.f32 1.442695, %v434_v24  ;;  %v1413_v50 = vmov 0.0|0.0   ;;  %v211_v24 = vand.u32 65535, %v1567_v42 }
  0xb6   :  { %v1335_v44 = vpop.eup %1334  ;;  %1348 = vpow2.f32 %v460_v56  ;;  %1240 = vmatprep.subr.bf16.mxu0 %v1413_v50  ;;  %v196_v56 = vand.u32 65535, %v1579_v47 }
  0xb7   :  { %v1337_v25 = vpop.eup %1336  ;;  %1350 = vpow2.f32 %v462_v9  ;;  %v483_v16 = vsel %vm97_vm0, %v1335_v44, 0.0 }
  0xb8   :  { %410 = vmin.xlane.f32.xlu1 %v1759_v8  ;;  %469 = vadd.xlane.f32.xlu0 %v468_v7  ;;  %v486_v28 = vsel %vm97_vm0, %v1337_v25, 0.0  ;;  %1352 = vpow2.f32 %v464_v46  ;;  %v213_v25 = vcvt.s32.f32 %v211_v24 }
  0xbb   :  { %v1339_v62 = vpop.eup %1338 }
  0xbc   :  { %472 = vadd.xlane.f32.xlu1 %v471_v53  ;;  %475 = vadd.xlane.f32.xlu0 %v474_v20  ;;  %v1341_v19 = vpop.eup %1340  ;;  %v492_v6 = vsel %vm97_vm0, %v1339_v62, 0.0  ;;  %v181_v53 = vand.u32 65535, %v1559_v38  ;;  %v226_v38 = vand.u32 65535, %v1587_v51 }
  0xbd   :  { %v1343_v4 = vpop.eup %1342  ;;  %v489_v31 = vsel %vm97_vm0, %v1341_v19, 0.0  ;;  %v256_v19 = vand.u32 65535, %v1609_v60 }
  0xbe   :  { %v1345_v48 = vpop.eup %1344  ;;  %v495_v13 = vsel %vm97_vm0, %v1343_v4, 0.0  ;;  %v183_v23 = vcvt.s32.f32 %v181_v53  ;;  %v228_v62 = vcvt.s32.f32 %v226_v38  ;;  %v1414_v38 = vmov 0  }
  0xbf   :  { %v1347_v0 = vpop.eup %1346  ;;  %v501_v58 = vsel %vm97_vm0, %v1345_v48, 0.0  ;;  %v258_v4 = vcvt.s32.f32 %v256_v19  ;;  %1302 = vset.pattern.permute.xlu1 %v1414_v38  ;;  %1308 = vset.pattern.permute.xlu0 %v1414_v38 }
  0xc0   :  { %478 = vadd.xlane.f32.xlu1 %v477_v12  ;;  %481 = vadd.xlane.f32.xlu0 %v480_v57  ;;  %v1349_v34 = vpop.eup %1348  ;;  %v498_v7 = vsel %vm97_vm0, %v1347_v0, 0.0  ;;  %v198_v57 = vcvt.s32.f32 %v196_v56 }
  0xc1   :  { %v1351_v17 = vpop.eup %1350  ;;  %v504_v36 = vsel %vm97_vm0, %v1349_v34, 0.0 }
  0xc2   :  { %v1353_v21 = vpop.eup %1352  ;;  %v507_v26 = vsel %vm97_vm0, %v1351_v17, 0.0 }
  0xc3   :  { %v510_v41 = vsel %vm97_vm0, %v1353_v21, 0.0  ;;  %v361_v21 = vand.u32 65535, %v1706_v40  ;;  %v391_v40 = vand.u32 65535, %v1729_v29 }
  0xc4   :  { %484 = vadd.xlane.f32.xlu1 %v483_v16  ;;  %487 = vadd.xlane.f32.xlu0 %v486_v28 }
  0xc5   :  { %v363_v53 = vcvt.s32.f32 %v361_v21 }
  0xc8   :  { %490 = vadd.xlane.f32.xlu1 %v489_v31  ;;  %493 = vadd.xlane.f32.xlu0 %v492_v6  ;;  %v286_v6 = vand.u32 65535, %v1636_v14 }
  0xca   :  { %v288_v0 = vcvt.s32.f32 %v286_v6 }
  0xcc   :  { %496 = vadd.xlane.f32.xlu0 %v495_v13  ;;  %502 = vadd.xlane.f32.xlu1 %v501_v58  ;;  %v316_v58 = vand.u32 65535, %v1677_v1 }
  0xd0   :  { %499 = vadd.xlane.f32.xlu0 %v498_v7  ;;  %505 = vadd.xlane.f32.xlu1 %v504_v36  ;;  %v318_v7 = vcvt.s32.f32 %v316_v58  ;;  %v346_v36 = vand.u32 65535, %v1703_v5  ;;  %v376_v5 = vand.u32 65535, %v1726_v43  ;;  %v406_v43 = vand.u32 65535, %v1740_v61 }
  0xd2   :  { %v378_v24 = vcvt.s32.f32 %v376_v5 }
  0xd4   :  { %508 = vadd.xlane.f32.xlu1 %v507_v26  ;;  %511 = vadd.xlane.f32.xlu0 %v510_v41  ;;  %v348_v41 = vcvt.s32.f32 %v346_v36 }
 0x125   :  { %v1787_v20 = vpop.xlane.xlu0 %185 }
 0x126   :  { %vm187_vm2 = vcmp.eq.f32.partialorder %v1575_v45, %v1787_v20  ;;  %v241_v45 = vand.u32 65535, %v1606_v59 }
 0x127   :  { %v188_v44 = vsel %vm187_vm2, %v183_v23, inf }
 0x128   :  { %189 = vmin.xlane.f32.xlu0 %v188_v44  ;;  %v243_v16 = vcvt.s32.f32 %v241_v45  ;;  %v393_v44 = vcvt.s32.f32 %v391_v40 }
 0x129   :  { %v1793_v9 = vpop.xlane.xlu1 %200  ;;  %v1795_v12 = vpop.xlane.xlu0 %215 }
 0x12a   :  { %vm202_vm3 = vcmp.eq.f32.partialorder %v1598_v55, %v1793_v9  ;;  %vm217_vm4 = vcmp.eq.f32.partialorder %v1596_v54, %v1795_v12  ;;  %v271_v54 = vand.u32 65535, %v1628_v10  ;;  %v301_v10 = vand.u32 65535, %v1653_v30 }
 0x12b   :  { %v203_v42 = vsel %vm202_vm3, %v198_v57, inf  ;;  %v218_v47 = vsel %vm217_vm4, %v213_v25, inf  ;;  %v331_v30 = vand.u32 65535, %v1680_v35  ;;  %v408_v25 = vcvt.s32.f32 %v406_v43 }
 0x12c   :  { %204 = vmin.xlane.f32.xlu1 %v203_v42  ;;  %219 = vmin.xlane.f32.xlu0 %v218_v47  ;;  %v273_v48 = vcvt.s32.f32 %v271_v54  ;;  %v303_v13 = vcvt.s32.f32 %v301_v10 }
 0x12d   :  { %v1803_v46 = vpop.xlane.xlu1 %230  ;;  %v1808_v51 = vpop.xlane.xlu0 %245 }
 0x12e   :  { %vm232_vm5 = vcmp.eq.f32.partialorder %v1619_v63, %v1803_v46  ;;  %vm247_vm6 = vcmp.eq.f32.partialorder %v1631_v11, %v1808_v51 }
 0x12f   :  { %v233_v55 = vsel %vm232_vm5, %v228_v62, inf  ;;  %v248_v59 = vsel %vm247_vm6, %v243_v16, inf }
 0x130   :  { %234 = vmin.xlane.f32.xlu1 %v233_v55  ;;  %249 = vmin.xlane.f32.xlu0 %v248_v59 }
 0x131   :  { %v1813_v28 = vpop.xlane.xlu1 %260  ;;  %v1818_v60 = vpop.xlane.xlu0 %275 }
 0x132   :  { %vm262_vm7 = vcmp.eq.f32.partialorder %v1642_v18, %v1813_v28  ;;  %vm277_vm8 = vcmp.eq.f32.partialorder %v1657_v32, %v1818_v60 }
 0x133   :  { %v263_v63 = vsel %vm262_vm7, %v258_v4, inf  ;;  %v278_v11 = vsel %vm277_vm8, %v273_v48, inf }
 0x134   :  { %264 = vmin.xlane.f32.xlu1 %v263_v63  ;;  %279 = vmin.xlane.f32.xlu0 %v278_v11 }
 0x135   :  { %v1823_v31 = vpop.xlane.xlu1 %290  ;;  %v1827_v14 = vpop.xlane.xlu0 %305 }
 0x136   :  { %vm292_vm9 = vcmp.eq.f32.partialorder %v1669_v37, %v1823_v31  ;;  %vm307_vm10 = vcmp.eq.f32.partialorder %v1684_v2, %v1827_v14  ;;  %v333_v37 = vcvt.s32.f32 %v331_v30 }
 0x137   :  { %v293_v18 = vsel %vm292_vm9, %v288_v0, inf  ;;  %v308_v32 = vsel %vm307_vm10, %v303_v13, inf }
 0x138   :  { %294 = vmin.xlane.f32.xlu1 %v293_v18  ;;  %309 = vmin.xlane.f32.xlu0 %v308_v32 }
 0x139   :  { %v1833_v34 = vpop.xlane.xlu1 %320  ;;  %v1835_v17 = vpop.xlane.xlu0 %335 }
 0x13a   :  { %vm322_vm11 = vcmp.eq.f32.partialorder %v1709_v22, %v1833_v34  ;;  %vm337_vm12 = vcmp.eq.f32.partialorder %v1711_v27, %v1835_v17 }
 0x13b   :  { %v323_v1 = vsel %vm322_vm11, %v318_v7, inf  ;;  %v338_v35 = vsel %vm337_vm12, %v333_v37, inf }
 0x13c   :  { %324 = vmin.xlane.f32.xlu1 %v323_v1  ;;  %339 = vmin.xlane.f32.xlu0 %v338_v35 }
 0x13d   :  { %v1843_v2 = vpop.xlane.xlu1 %350  ;;  %v1845_v26 = vpop.xlane.xlu0 %365 }
 0x13e   :  { %vm352_vm13 = vcmp.eq.f32.partialorder %v1733_v39, %v1843_v2  ;;  %vm367_vm14 = vcmp.eq.f32.partialorder %v1735_v52, %v1845_v26 }
 0x13f   :  { %v353_v22 = vsel %vm352_vm13, %v348_v41, inf  ;;  %v368_v27 = vsel %vm367_vm14, %v363_v53, inf }
 0x140   :  { %354 = vmin.xlane.f32.xlu1 %v353_v22  ;;  %369 = vmin.xlane.f32.xlu0 %v368_v27 }
 0x141   :  { %v1853_v23 = vpop.xlane.xlu1 %380  ;;  %v1855_v56 = vpop.xlane.xlu0 %395 }
 0x142   :  { %vm382_vm15 = vcmp.eq.f32.partialorder %v1746_v49, %v1853_v23  ;;  %vm397_vm1 = vcmp.eq.f32.partialorder %v1751_v3, %v1855_v56 }
 0x143   :  { %v383_v29 = vsel %vm382_vm15, %v378_v24, inf  ;;  %v398_v39 = vsel %vm397_vm1, %v393_v44, inf }
 0x144   :  { %384 = vmin.xlane.f32.xlu1 %v383_v29  ;;  %399 = vmin.xlane.f32.xlu0 %v398_v39 }
 0x145   :  { %v1862_v52 = vpop.xlane.xlu1 %410  ;;  %v470_v57 = vpop.xlane.xlu0 %469 }
 0x146   :  { %1354 = vrcp.f32 %v470_v57  ;;  %vm412_vm2 = vcmp.eq.f32.partialorder %v1759_v8, %v1862_v52 }
 0x147   :  { %v413_v61 = vsel %vm412_vm2, %v408_v25, inf }
 0x148   :  { %414 = vmin.xlane.f32.xlu1 %v413_v61 }
 0x149   :  { %v473_v49 = vpop.xlane.xlu1 %472  ;;  %v476_v42 = vpop.xlane.xlu0 %475 }
 0x14a   :  { %1356 = vrcp.f32 %v473_v49 }
 0x14b   :  { %1358 = vrcp.f32 %v476_v42 }
 0x14d   :  { %v479_v3 = vpop.xlane.xlu1 %478  ;;  %v482_v47 = vpop.xlane.xlu0 %481 }
 0x14e   :  { %1360 = vrcp.f32 %v479_v3 }
 0x14f   :  { %1362 = vrcp.f32 %v482_v47 }
 0x150   :  { %v1866_v45 = vpop.eup %1354 }
 0x151   :  { %v485_v62 = vpop.xlane.xlu1 %484  ;;  %v488_v19 = vpop.xlane.xlu0 %487  ;;  %v680_v55 = vmul.f32 15.0, %v1866_v45 }
 0x152   :  { %1364 = vrcp.f32 %v485_v62 }
 0x153   :  { %1366 = vrcp.f32 %v488_v19  ;;  %v696_v16 = vceil.f32 %v680_v55 }
 0x154   :  { %v1869_v8 = vpop.eup %1356 }
 0x155   :  { %v1871_v54 = vpop.eup %1358  ;;  %v491_v59 = vpop.xlane.xlu1 %490  ;;  %v681_v4 = vmul.f32 15.0, %v1869_v8  ;;  %v1264_v6 = vtrunc.f32 %v696_v16 }
 0x156   :  { %v494_v63 = vpop.xlane.xlu0 %493  ;;  %1368 = vrcp.f32 %v491_v59  ;;  %v682_v48 = vmul.f32 15.0, %v1871_v54 }
 0x157   :  { %v697_v10 = vceil.f32 %v681_v4  ;;  %v1265_v11 = vcvt.f32.s32 %v1264_v6  ;;  %1370 = vrcp.f32 %v494_v63 }
 0x158   :  { %v1875_v0 = vpop.eup %1360  ;;  %v698_v18 = vceil.f32 %v682_v48 }
 0x159   :  { %v1877_v13 = vpop.eup %1362  ;;  %v1266_v58 = vtrunc.f32 %v697_v10  ;;  %v1140_v30 = vadd.s32 4294967295, %v1265_v11  ;;  %v683_v32 = vmul.f32 15.0, %v1875_v0  ;;  %v503_v37 = vpop.xlane.xlu1 %502 }
 0x15a   :  { %v497_v7 = vpop.xlane.xlu0 %496  ;;  %v1268_v36 = vtrunc.f32 %v698_v18  ;;  %v684_v21 = vmul.f32 15.0, %v1877_v13 }
 0x15b   :  { %v1267_v1 = vcvt.f32.s32 %v1266_v58  ;;  %vm744_vm3 = vcmp.gt.s32.totalorder %v1140_v30, 0  ;;  %v699_v35 = vceil.f32 %v683_v32  ;;  %1372 = vrcp.f32 %v497_v7 }
 0x15c   :  { %v1881_v41 = vpop.eup %1364  ;;  %v745_v53 = vsel %vm744_vm3, %v1140_v30, 0  ;;  %v1269_v5 = vcvt.f32.s32 %v1268_v36  ;;  %v700_v40 = vceil.f32 %v684_v21  ;;  %1374 = vrcp.f32 %v503_v37 }
 0x15d   :  { %v1883_v22 = vpop.eup %1366  ;;  %v1141_v27 = vadd.s32 4294967295, %v1267_v1  ;;  %vm776_vm4 = vcmp.lt.s32.totalorder %v745_v53, 14  ;;  %v1270_v24 = vtrunc.f32 %v699_v35  ;;  %v685_v44 = vmul.f32 15.0, %v1881_v41  ;;  %v506_v47 = vpop.xlane.xlu1 %505 }
 0x15e   :  { %v777_v43 = vsel %vm776_vm4, %v745_v53, 14  ;;  %v1142_v29 = vadd.s32 4294967295, %v1269_v5  ;;  %v1272_v39 = vtrunc.f32 %v700_v40  ;;  %v686_v57 = vmul.f32 15.0, %v1883_v22  ;;  %v500_v48 = vpop.xlane.xlu0 %499 }
 0x15f   :  { %vm746_vm5 = vcmp.gt.s32.totalorder %v1141_v27, 0  ;;  %vm824_vm6 = vcmp.eq.s32.totalorder %v1546_v33, %v777_v43  ;;  %v1271_v25 = vcvt.f32.s32 %v1270_v24  ;;  %v701_v38 = vceil.f32 %v685_v44 }
 0x160   :  { %v1888_v61 = vpop.eup %1368  ;;  %v747_v49 = vsel %vm746_vm5, %v1141_v27, 0  ;;  %vm748_vm7 = vcmp.gt.s32.totalorder %v1142_v29, 0  ;;  %v1273_v42 = vcvt.f32.s32 %v1272_v39  ;;  %v702_v3 = vceil.f32 %v686_v57 }
 0x161   :  { %vm778_vm8 = vcmp.lt.s32.totalorder %v747_v49, 14  ;;  %v1143_v62 = vadd.s32 4294967295, %v1271_v25  ;;  %v749_v19 = vsel %vm748_vm7, %v1142_v29, 0  ;;  %v1274_v55 = vtrunc.f32 %v701_v38  ;;  %v1892_v10 = vpop.eup %1370  ;;  %v509_v35 = vpop.xlane.xlu1 %508 }
 0x162   :  { %v779_v16 = vsel %vm778_vm8, %v747_v49, 14  ;;  %vm780_vm9 = vcmp.lt.s32.totalorder %v749_v19, 14  ;;  %v1144_v59 = vadd.s32 4294967295, %v1273_v42  ;;  %v687_v4 = vmul.f32 15.0, %v1888_v61 }
 0x163   :  { %vm825_vm10 = vcmp.eq.s32.totalorder %v1546_v33, %v779_v16  ;;  %vm750_vm11 = vcmp.gt.s32.totalorder %v1143_v62, 0  ;;  %v781_v6 = vsel %vm780_vm9, %v749_v19, 14  ;;  %v1275_v63 = vcvt.f32.s32 %v1274_v55 }
 0x164   :  { %vm1241_vm12 = vmpackc.low %vm825_vm10, %vm824_vm6  ;;  %v751_v11 = vsel %vm750_vm11, %v1143_v62, 0  ;;  %vm826_vm13 = vcmp.eq.s32.totalorder %v1546_v33, %v781_v6  ;;  %vm752_vm14 = vcmp.gt.s32.totalorder %v1144_v59, 0  ;;  %v703_v18 = vceil.f32 %v687_v4 }
 0x165   :  { %v1897_v58 = vpop.eup %1372  ;;  %v1415_v30 = vmov 1.0|1.0   ;;  %vm782_vm15 = vcmp.lt.s32.totalorder %v751_v11, 14  ;;  %v1145_v32 = vadd.s32 4294967295, %v1275_v63  ;;  %v753_v7 = vsel %vm752_vm14, %v1144_v59, 0 }
 0x166   :  { %1242 = vmatpush3.bf16.msk.msra.mxu0 %vm1241_vm12, %v1415_v30  ;;  %v1276_v37 = vtrunc.f32 %v702_v3  ;;  %v1900_v36 = vpop.eup %1374  ;;  %v783_v21 = vsel %vm782_vm15, %v751_v11, 14  ;;  %vm784_vm1 = vcmp.lt.s32.totalorder %v753_v7, 14  ;;  %v1278_v1 = vtrunc.f32 %v703_v18 }
 0x167   :  { %1243 = vmatprep.subr.bf16.mxu0 %v1413_v50  ;;  %1376 = vrcp.f32 %v500_v48  ;;  %vm827_vm2 = vcmp.eq.s32.totalorder %v1546_v33, %v783_v21  ;;  %vm754_vm3 = vcmp.gt.s32.totalorder %v1145_v32, 0  ;;  %v785_v53 = vsel %vm784_vm1, %v753_v7, 14 }
 0x168   :  { %v1277_v5 = vcvt.f32.s32 %v1276_v37  ;;  %vm1244_vm4 = vmpackc.low %vm827_vm2, %vm826_vm13  ;;  %v755_v40 = vsel %vm754_vm3, %v1145_v32, 0  ;;  %v1279_v27 = vcvt.f32.s32 %v1278_v1  ;;  %1378 = vrcp.f32 %v506_v47 }
 0x169   :  { %vm786_vm5 = vcmp.lt.s32.totalorder %v755_v40, 14  ;;  %1380 = vrcp.f32 %v509_v35  ;;  %v688_v44 = vmul.f32 15.0, %v1892_v10  ;;  %vm828_vm6 = vcmp.eq.s32.totalorder %v1546_v33, %v785_v53 }
 0x16a   :  { %1245 = vmatpush3.bf16.msk.msra.mxu0 %vm1244_vm4, %v1415_v30  ;;  %v1146_v24 = vadd.s32 4294967295, %v1277_v5  ;;  %v787_v43 = vsel %vm786_vm5, %v755_v40, 14  ;;  %v1147_v29 = vadd.s32 4294967295, %v1279_v27  ;;  %v689_v39 = vmul.f32 15.0, %v1897_v58 }
 0x16b   :  { %1246 = vmatprep.subr.bf16.mxu0 %v1413_v50  ;;  %vm829_vm7 = vcmp.eq.s32.totalorder %v1546_v33, %v787_v43  ;;  %v704_v57 = vceil.f32 %v688_v44  ;;  %v691_v25 = vmul.f32 15.0, %v1900_v36 }
 0x16c   :  { %vm756_vm8 = vcmp.gt.s32.totalorder %v1146_v24, 0  ;;  %vm1247_vm9 = vmpackc.low %vm829_vm7, %vm828_vm6  ;;  %vm758_vm10 = vcmp.gt.s32.totalorder %v1147_v29, 0  ;;  %v705_v49 = vceil.f32 %v689_v39 }
 0x16d   :  { %v757_v38 = vsel %vm756_vm8, %v1146_v24, 0  ;;  %v759_v42 = vsel %vm758_vm10, %v1147_v29, 0  ;;  %v1280_v3 = vtrunc.f32 %v704_v57  ;;  %v707_v47 = vceil.f32 %v691_v25 }
 0x16e   :  { %1248 = vmatpush3.bf16.msk.msra.mxu0 %vm1247_vm9, %v1415_v30  ;;  %vm788_vm11 = vcmp.lt.s32.totalorder %v757_v38, 14  ;;  %vm790_vm12 = vcmp.lt.s32.totalorder %v759_v42, 14  ;;  %v1282_v19 = vtrunc.f32 %v705_v49 }
 0x16f   :  { %1249 = vmatprep.subr.bf16.mxu0 %v1413_v50  ;;  %v789_v62 = vsel %vm788_vm11, %v757_v38, 14  ;;  %v791_v55 = vsel %vm790_vm12, %v759_v42, 14  ;;  %v1281_v16 = vcvt.f32.s32 %v1280_v3  ;;  %v1286_v59 = vtrunc.f32 %v707_v47 }
 0x170   :  { %vm830_vm13 = vcmp.eq.s32.totalorder %v1546_v33, %v789_v62  ;;  %vm831_vm14 = vcmp.eq.s32.totalorder %v1546_v33, %v791_v55  ;;  %v1283_v6 = vcvt.f32.s32 %v1282_v19 }
 0x171   :  { %v1915_v4 = vpop.eup %1376  ;;  %vm1250_vm15 = vmpackc.low %vm831_vm14, %vm830_vm13  ;;  %v1148_v63 = vadd.s32 4294967295, %v1281_v16  ;;  %v1287_v11 = vcvt.f32.s32 %v1286_v59 }
 0x172   :  { %v690_v48 = vmul.f32 15.0, %v1915_v4  ;;  %v1920_v18 = vpop.eup %1378  ;;  %1251 = vmatpush3.bf16.msk.msra.mxu0 %vm1250_vm15, %v1415_v30  ;;  %v1149_v32 = vadd.s32 4294967295, %v1283_v6 }
 0x173   :  { %v1923_v7 = vpop.eup %1380  ;;  %1252 = vmatprep.subr.bf16.mxu0 %v1413_v50  ;;  %vm760_vm1 = vcmp.gt.s32.totalorder %v1148_v63, 0  ;;  %v1151_v21 = vadd.s32 4294967295, %v1287_v11  ;;  %v692_v1 = vmul.f32 15.0, %v1920_v18  ;;  %v192_v11 = vcvt.f32.s32 %v1787_v20 }
 0x174   :  { %v706_v37 = vceil.f32 %v690_v48  ;;  %v761_v35 = vsel %vm760_vm1, %v1148_v63, 0  ;;  %vm762_vm2 = vcmp.gt.s32.totalorder %v1149_v32, 0  ;;  %v693_v53 = vmul.f32 15.0, %v1923_v7  ;;  %v1940_v48 = vpop.xlane.xlu0 %511 }
 0x175   :  { %v763_v5 = vsel %vm762_vm2, %v1149_v32, 0  ;;  %vm792_vm3 = vcmp.lt.s32.totalorder %v761_v35, 14  ;;  %vm766_vm4 = vcmp.gt.s32.totalorder %v1151_v21, 0  ;;  %v708_v44 = vceil.f32 %v692_v1 }
 0x176   :  { %v1284_v40 = vtrunc.f32 %v706_v37  ;;  %v793_v27 = vsel %vm792_vm3, %v761_v35, 14  ;;  %vm794_vm5 = vcmp.lt.s32.totalorder %v763_v5, 14  ;;  %v767_v24 = vsel %vm766_vm4, %v1151_v21, 0 }
 0x177   :  { %v795_v43 = vsel %vm794_vm5, %v763_v5, 14  ;;  %vm832_vm6 = vcmp.eq.s32.totalorder %v1546_v33, %v793_v27  ;;  %vm798_vm7 = vcmp.lt.s32.totalorder %v767_v24, 14  ;;  %v709_v39 = vceil.f32 %v693_v53 }
 0x178   :  { %v1285_v29 = vcvt.f32.s32 %v1284_v40  ;;  %vm833_vm8 = vcmp.eq.s32.totalorder %v1546_v33, %v795_v43  ;;  %v1288_v57 = vtrunc.f32 %v708_v44  ;;  %v799_v38 = vsel %vm798_vm7, %v767_v24, 14  ;;  %v548_v40 = vld [vmem:[%s2159_s1] sm:$0xff] }
 0x179   :  { %vm1253_vm9 = vmpackc.low %vm833_vm8, %vm832_vm6  ;;  %v1290_v42 = vtrunc.f32 %v709_v39  ;;  %vm835_vm12 = vcmp.eq.s32.totalorder %v1546_v33, %v799_v38  ;;  %v207_v32 = vcvt.f32.s32 %v1793_v9  ;;  %v193_v21 = vshll.u32 %v192_v11, 16 }
 0x17a   :  { %v1150_v25 = vadd.s32 4294967295, %v1285_v29  ;;  %1254 = vmatpush3.bf16.msk.msra.mxu0 %vm1253_vm9, %v1415_v30  ;;  %v1289_v49 = vcvt.f32.s32 %v1288_v57  ;;  %v222_v1 = vcvt.f32.s32 %v1795_v12  ;;  %v237_v44 = vcvt.f32.s32 %v1803_v46  ;;  %v549_v12 = vld [vmem:[%s2159_s1 + $0x8] sm:$0xff] }
 0x17b   :  { %1255 = vmatprep.subr.bf16.mxu0 %v1413_v50  ;;  %v1291_v47 = vcvt.f32.s32 %v1290_v42  ;;  %v208_v5 = vshll.u32 %v207_v32, 16  ;;  %v252_v9 = vcvt.f32.s32 %v1808_v51  ;;  %v267_v57 = vcvt.f32.s32 %v1813_v28 }
 0x17c   :  { %vm764_vm10 = vcmp.gt.s32.totalorder %v1150_v25, 0  ;;  %v1152_v62 = vadd.s32 4294967295, %v1289_v49  ;;  %v238_v49 = vshll.u32 %v237_v44, 16  ;;  %v282_v51 = vcvt.f32.s32 %v1818_v60 }
 0x17d   :  { %v765_v3 = vsel %vm764_vm10, %v1150_v25, 0  ;;  %v1153_v55 = vadd.s32 4294967295, %v1291_v47  ;;  %v550_v25 = vld [vmem:[%s2159_s1 + $0x10] sm:$0xff]  ;;  %v253_v42 = vshll.u32 %v252_v9, 16  ;;  %v297_v11 = vcvt.f32.s32 %v1823_v31 }
 0x17e   :  { %vm796_vm11 = vcmp.lt.s32.totalorder %v765_v3, 14  ;;  %vm768_vm13 = vcmp.gt.s32.totalorder %v1152_v62, 0 }
 0x17f   :  { %v797_v19 = vsel %vm796_vm11, %v765_v3, 14  ;;  %v769_v16 = vsel %vm768_vm13, %v1152_v62, 0  ;;  %vm770_vm1 = vcmp.gt.s32.totalorder %v1153_v55, 0  ;;  %v551_v3 = vld [vmem:[%s2159_s1 + $0x18] sm:$0xff]  ;;  %v1416_v62 = vmov 0.0  }
 0x180   :  { %vm834_vm14 = vcmp.eq.s32.totalorder %v1546_v33, %v797_v19  ;;  %vm800_vm2 = vcmp.lt.s32.totalorder %v769_v16, 14  ;;  %v771_v59 = vsel %vm770_vm1, %v1153_v55, 0 }
 0x181   :  { %vm1256_vm15 = vmpackc.low %vm835_vm12, %vm834_vm14  ;;  %v801_v6 = vsel %vm800_vm2, %v769_v16, 14  ;;  %vm802_vm3 = vcmp.lt.s32.totalorder %v771_v59, 14 }
 0x182   :  { %1257 = vmatpush3.bf16.msk.msra.mxu0 %vm1256_vm15, %v1415_v30  ;;  %vm836_vm4 = vcmp.eq.s32.totalorder %v1546_v33, %v801_v6  ;;  %v803_v63 = vsel %vm802_vm3, %v771_v59, 14  ;;  %v268_v6 = vshll.u32 %v267_v57, 16 }
 0x183   :  { %1258 = vmatprep.subr.bf16.mxu0 %v1413_v50  ;;  %vm837_vm5 = vcmp.eq.s32.totalorder %v1546_v33, %v803_v63  ;;  %v552_v63 = vld [vmem:[%s2159_s1 + $0x20] sm:$0xff] }
 0x184   :  { %vm1259_vm6 = vmpackc.low %vm837_vm5, %vm836_vm4 }
 0x186   :  { %1260 = vmatpush3.bf16.msk.msra.mxu0 %vm1259_vm6, %v1415_v30 }
 0x187   :  { %1261 = vmatprep.subr.bf16.mxu0 %v1413_v50  ;;  %v223_v50 = vshll.u32 %v222_v1, 16  ;;  %v312_v1 = vcvt.f32.s32 %v1827_v14  ;;  %v298_v14 = vshll.u32 %v297_v11, 16 }
 0x189   :  { %v313_v9 = vshll.u32 %v312_v1, 16 }
 0x1b5   :  { %v190_v37 = vpop.xlane.xlu0 %189 }
 0x1b6   :  { %v191_v35 = vcvt.f32.s32 %v190_v37 }
 0x1b8   :  { %v194_v53 = vadd.s32 %v193_v21, %v191_v35  ;;  %v283_v21 = vshll.u32 %v282_v51, 16  ;;  %v553_v35 = vld [vmem:[%s2159_s1 + $0x28] sm:$0xff] }
 0x1b9   :  { %v205_v27 = vpop.xlane.xlu1 %204  ;;  %v220_v24 = vpop.xlane.xlu0 %219 }
 0x1ba   :  { %v206_v43 = vcvt.f32.s32 %v205_v27  ;;  %v221_v20 = vcvt.f32.s32 %v220_v24  ;;  %vm632_vm7 = vcmp.eq.s32.totalorder %v194_v53, %v548_v40 }
 0x1bb   :  { %v664_v19 = vsel %vm632_vm7, 1.0, %v1416_v62  ;;  %vm1417_vm7 = vmmov 0  }
 0x1bc   :  { %v209_v29 = vadd.s32 %v208_v5, %v206_v43  ;;  %v224_v39 = vadd.s32 %v223_v50, %v221_v20  ;;  %v554_v50 = vld [vmem:[%s2159_s1 + $0x30] sm:$0xff]  ;;  %1237 = vmatprep.mubr.msk.f32.mxu0 %vm1417_vm7, %v1416_v62 }
 0x1bd   :  { %v235_v38 = vpop.xlane.xlu1 %234  ;;  %v250_v47 = vpop.xlane.xlu0 %249 }
 0x1be   :  { %vm633_vm8 = vcmp.eq.s32.totalorder %v209_v29, %v549_v12  ;;  %v236_v46 = vcvt.f32.s32 %v235_v38  ;;  %vm634_vm9 = vcmp.eq.s32.totalorder %v224_v39, %v550_v25  ;;  %v251_v16 = vcvt.f32.s32 %v250_v47  ;;  %v555_v29 = vld [vmem:[%s2159_s1 + $0x38] sm:$0xff] }
 0x1bf   :  { %v665_v28 = vsel %vm633_vm8, 1.0, %v1416_v62  ;;  %v666_v5 = vsel %vm634_vm9, 1.0, %v1416_v62  ;;  %v327_v12 = vcvt.f32.s32 %v1833_v34  ;;  %v357_v34 = vcvt.f32.s32 %v1843_v2 }
 0x1c0   :  { %v239_v55 = vadd.s32 %v238_v49, %v236_v46  ;;  %v1303_v59 = vpack.i.bf16 %v665_v28, %v664_v19  ;;  %v254_v32 = vadd.s32 %v253_v42, %v251_v16  ;;  %v556_v42 = vld [vmem:[%s2159_s1 + $0x40] sm:$0xff]  ;;  %vm874_vm8 = vcmp.eq.s32.totalorder %v1546_v33, 2 }
 0x1c1   :  { %v265_v60 = vpop.xlane.xlu1 %264  ;;  %v280_v53 = vpop.xlane.xlu0 %279  ;;  %v328_v16 = vshll.u32 %v327_v12, 16  ;;  %v358_v2 = vshll.u32 %v357_v34, 16  ;;  %v561_v12 = vld [vmem:[%s2159_s1 + $0x68] sm:$0xff]  ;;  %vm873_vm9 = vcmp.eq.s32.totalorder %v1546_v33, 1 }
 0x1c2   :  { %vm635_vm10 = vcmp.eq.s32.totalorder %v239_v55, %v551_v3  ;;  %v266_v37 = vcvt.f32.s32 %v265_v60  ;;  %1304 = vperm.xlu1 %1302, %v1303_v59   ;;  %vm636_vm11 = vcmp.eq.s32.totalorder %v254_v32, %v552_v63  ;;  %v281_v31 = vcvt.f32.s32 %v280_v53  ;;  %v557_v60 = vld [vmem:[%s2159_s1 + $0x48] sm:$0xff] }
 0x1c3   :  { %v667_v40 = vsel %vm635_vm10, 1.0, %v1416_v62  ;;  %v668_v57 = vsel %vm636_vm11, 1.0, %v1416_v62  ;;  %v372_v3 = vcvt.f32.s32 %v1845_v26  ;;  %vm872_vm10 = vcmp.eq.s32.totalorder %v1546_v33, 0 }
 0x1c4   :  { %v269_v27 = vadd.s32 %v268_v6, %v266_v37  ;;  %v1309_v24 = vpack.i.bf16 %v667_v40, %v666_v5  ;;  %v284_v43 = vadd.s32 %v283_v21, %v281_v31  ;;  %v387_v21 = vcvt.f32.s32 %v1853_v23  ;;  %v559_v5 = vld [vmem:[%s2159_s1 + $0x58] sm:$0xff] }
 0x1c5   :  { %v295_v44 = vpop.xlane.xlu1 %294  ;;  %v310_v39 = vpop.xlane.xlu0 %309  ;;  %v373_v26 = vshll.u32 %v372_v3, 16  ;;  %v402_v23 = vcvt.f32.s32 %v1855_v56  ;;  %v562_v56 = vld [vmem:[%s2159_s1 + $0x70] sm:$0xff]  ;;  %v342_v3 = vcvt.f32.s32 %v1835_v17 }
 0x1c6   :  { %vm637_vm12 = vcmp.eq.s32.totalorder %v269_v27, %v553_v35  ;;  %v296_v20 = vcvt.f32.s32 %v295_v44  ;;  %1310 = vperm.xlu0 %1308, %v1309_v24   ;;  %vm638_vm13 = vcmp.eq.s32.totalorder %v284_v43, %v554_v50  ;;  %v311_v49 = vcvt.f32.s32 %v310_v39  ;;  %v560_v50 = vld [vmem:[%s2159_s1 + $0x60] sm:$0xff] }
 0x1c7   :  { %v669_v25 = vsel %vm637_vm12, 1.0, %v1416_v62  ;;  %v670_v28 = vsel %vm638_vm13, 1.0, %v1416_v62  ;;  %v388_v44 = vshll.u32 %v387_v21, 16 }
 0x1c8   :  { %v299_v38 = vadd.s32 %v298_v14, %v296_v20  ;;  %v1314_v46 = vpack.i.bf16 %v669_v25, %v668_v57  ;;  %v314_v51 = vadd.s32 %v313_v9, %v311_v49  ;;  %v1388_v25 = vld [vmem:[%s2158_s0 + $0x78] sm:$0xff] }
 0x1c9   :  { %v325_v47 = vpop.xlane.xlu1 %324  ;;  %v340_v19 = vpop.xlane.xlu0 %339 }
 0x1ca   :  { %vm639_vm14 = vcmp.eq.s32.totalorder %v299_v38, %v555_v29  ;;  %1315 = vperm.xlu0 %1308, %v1314_v46   ;;  %v326_v59 = vcvt.f32.s32 %v325_v47  ;;  %vm640_vm15 = vcmp.eq.s32.totalorder %v314_v51, %v556_v42  ;;  %v403_v29 = vshll.u32 %v402_v23, 16 }
 0x1cb   :  { %v671_v55 = vsel %vm639_vm14, 1.0, %v1416_v62  ;;  %v672_v63 = vsel %vm640_vm15, 1.0, %v1416_v62  ;;  %v435_v38 = vsub.f32 %v1388_v25, %v1700_v15  ;;  %v341_v47 = vcvt.f32.s32 %v340_v19 }
 0x1cc   :  { %v1319_v6 = vpack.i.bf16 %v671_v55, %v670_v28  ;;  %v329_v11 = vadd.s32 %v328_v16, %v326_v59  ;;  %v343_v55 = vshll.u32 %v342_v3, 16  ;;  %v417_v15 = vcvt.f32.s32 %v1862_v52 }
 0x1cd   :  { %v355_v32 = vpop.xlane.xlu1 %354  ;;  %v370_v37 = vpop.xlane.xlu0 %369  ;;  %v466_v46 = vmul.f32 1.442695, %v435_v38 }
 0x1ce   :  { %919 = vperm.xlu0 %1308, %v672_v63   ;;  %1320 = vperm.xlu1 %1302, %v1319_v6   ;;  %v356_v1 = vcvt.f32.s32 %v355_v32  ;;  %v371_v35 = vcvt.f32.s32 %v370_v37  ;;  %vm641_vm1 = vcmp.eq.s32.totalorder %v329_v11, %v557_v60  ;;  %v344_v16 = vadd.s32 %v343_v55, %v341_v47  ;;  %v558_v6 = vld [vmem:[%s2159_s1 + $0x50] sm:$0xff]  ;;  %v563_v11 = vld [vmem:[%s2159_s1 + $0x78] sm:$0xff]  ;;  %s1418_s1 = smov [#allocation2]  }
 0x1cf   :  { %v673_v53 = vsel %vm641_vm1, 1.0, %v1416_v62  ;;  %1382 = vpow2.f32 %v466_v46  ;;  %v418_v63 = vshll.u32 %v417_v15, 16  ;;  %s1120_s18 = sshll.u32 %s1418_s1, 4  ;;  %s1121_s18 = int_to_ptr.vmem [resolvable:$true] %s1120_s18 }
 0x1d0   :  { %v359_v40 = vadd.s32 %v358_v2, %v356_v1  ;;  %v374_v27 = vadd.s32 %v373_v26, %v371_v35  ;;  %vm642_vm6 = vcmp.eq.s32.totalorder %v344_v16, %v558_v6  ;;  %1384 = vrcp.f32 %v1940_v48  ;;  %s1389_s19 = scalar_lea.vmem %s1121_s18, 128  ;;  %p1394_p1 = scmp.lt.s32.totalorder %s1121_s18, %s1121_s18 }
 0x1d1   :  { %v385_v31 = vpop.xlane.xlu1 %384  ;;  %v400_v24 = vpop.xlane.xlu0 %399  ;;  %v674_v17 = vsel %vm642_vm6, 1.0, %v1416_v62  ;;  %p1390_p0 = scmp.ne.s32.totalorder %s1121_s18, %s1389_s19  ;;  %p1395_p2 = scmp.lt.s32.totalorder %s1389_s19, %s1389_s19 }
 0x1d2   :  { %924 = vperm.xlu0 %1308, %v673_v53   ;;  %v386_v14 = vcvt.f32.s32 %v385_v31  ;;  %vm643_vm2 = vcmp.eq.s32.totalorder %v359_v40, %v559_v5  ;;  %v401_v9 = vcvt.f32.s32 %v400_v24  ;;  %vm644_vm3 = vcmp.eq.s32.totalorder %v374_v27, %v560_v50 }
 0x1d3   :  { %v675_v43 = vsel %vm643_vm2, 1.0, %v1416_v62  ;;  %v676_v39 = vsel %vm644_vm3, 1.0, %v1416_v62  ;;  %p1396_p3 = por %p1395_p2, %p1394_p1 }
 0x1d4   :  { %v389_v20 = vadd.s32 %v388_v44, %v386_v14  ;;  %v404_v57 = vadd.s32 %v403_v29, %v401_v9 }
 0x1d5   :  { %v415_v28 = vpop.xlane.xlu1 %414  ;;  %p1397_p4 = pnand %p1396_p3, %p1390_p0 }
 0x1d6   :  { %934 = vperm.xlu0 %1308, %v675_v43   ;;  %vm645_vm4 = vcmp.eq.s32.totalorder %v389_v20, %v561_v12  ;;  %vm646_vm5 = vcmp.eq.s32.totalorder %v404_v57, %v562_v56  ;;  %v416_v59 = vcvt.f32.s32 %v415_v28 }
 0x1d7   :  { %v677_v49 = vsel %vm645_vm4, 1.0, %v1416_v62  ;;  %v678_v42 = vsel %vm646_vm5, 1.0, %v1416_v62 }
 0x1d8   :  { %v419_v60 = vadd.s32 %v418_v63, %v416_v59 }
 0x1d9   :  { %v1383_v51 = vpop.eup %1382 }
 0x1da   :  { %939 = vperm.xlu0 %1308, %v676_v39   ;;  %v513_v34 = vsel %vm97_vm0, %v1383_v51, 0.0  ;;  %vm647_vm0 = vcmp.eq.s32.totalorder %v419_v60, %v563_v11  ;;  %v1385_v28 = vpop.eup %1384 }
 0x1db   :  { %v679_v19 = vsel %vm647_vm0, 1.0, %v1416_v62 }
 0x1de   :  { %944 = vperm.xlu0 %1308, %v677_v49  }
 0x1e2   :  { %949 = vperm.xlu0 %1308, %v678_v42  }
 0x1f2   :  { %514 = vadd.xlane.f32.xlu1 %v513_v34 }
 0x203   :  { %929 = vperm.xlu1 %1302, %v674_v17  }
 0x207   :  { %954 = vperm.xlu1 %1302, %v679_v19  }
 0x241   :  { %v1305_v52 = vpop.permute.xlu1 %1304 }
 0x242   :  { %v1307_v2 = vunpack.i.h.bf16 %v1305_v52  ;;  %v1306_v26 = vunpack.i.l.bf16 %v1305_v52 }
 0x244   :  { %v958_v32 = vsel %vm874_vm8, %v1307_v2, 0.0  ;;  %v957_v37 = vsel %vm874_vm8, %v1306_v26, 0.0 }
 0x245   :  { %v1311_v21 = vpop.permute.xlu0 %1310  ;;  %v975_v62 = vsel %vm873_vm9, %v1866_v45, %v957_v37  ;;  %v976_v53 = vsel %vm873_vm9, %v1869_v8, %v958_v32 }
 0x246   :  { %v1312_v1 = vunpack.i.l.bf16 %v1311_v21  ;;  %v993_v35 = vsel %vm872_vm10, 1.0, %v975_v62  ;;  %v1313_v5 = vunpack.i.h.bf16 %v1311_v21  ;;  %v994_v31 = vsel %vm872_vm10, 1.0, %v976_v53 }
 0x247   :  { %1010 = vxpose.xlu0.b32.start [1/16] (narrow) %v993_v35, 8 }
 0x248   :  { %v959_v40 = vsel %vm874_vm8, %v1312_v1, 0.0  ;;  %v960_v24 = vsel %vm874_vm8, %v1313_v5, 0.0 }
 0x249   :  { %v1316_v27 = vpop.permute.xlu0 %1315  ;;  %v977_v45 = vsel %vm873_vm9, %v1871_v54, %v959_v40  ;;  %v978_v44 = vsel %vm873_vm9, %v1875_v0, %v960_v24 }
 0x24a   :  { %v1317_v50 = vunpack.i.l.bf16 %v1316_v27  ;;  %v995_v8 = vsel %vm872_vm10, 1.0, %v977_v45  ;;  %v1318_v23 = vunpack.i.h.bf16 %v1316_v27  ;;  %v996_v54 = vsel %vm872_vm10, 1.0, %v978_v44 }
 0x24b   :  { %1011 = vxpose.xlu0.b32.cont [2/16] (narrow) %v994_v31, 8 }
 0x24c   :  { %v961_v14 = vsel %vm874_vm8, %v1317_v50, 0.0  ;;  %v962_v9 = vsel %vm874_vm8, %v1318_v23, 0.0 }
 0x24d   :  { %v1321_v43 = vpop.permute.xlu1 %1320  ;;  %v979_v20 = vsel %vm873_vm9, %v1877_v13, %v961_v14  ;;  %v980_v29 = vsel %vm873_vm9, %v1881_v41, %v962_v9  ;;  %v920_v13 = vpop.permute.xlu0 %919 }
 0x24e   :  { %v1322_v12 = vunpack.i.l.bf16 %v1321_v43  ;;  %v997_v0 = vsel %vm872_vm10, 1.0, %v979_v20  ;;  %v1323_v39 = vunpack.i.h.bf16 %v1321_v43  ;;  %v998_v56 = vsel %vm872_vm10, 1.0, %v980_v29 }
 0x24f   :  { %1012 = vxpose.xlu0.b32.cont [3/16] (narrow) %v995_v8, 8  ;;  %v965_v46 = vsel %vm874_vm8, %v920_v13, 0.0 }
 0x250   :  { %v963_v57 = vsel %vm874_vm8, %v1322_v12, 0.0  ;;  %v964_v38 = vsel %vm874_vm8, %v1323_v39, 0.0 }
 0x251   :  { %v981_v25 = vsel %vm873_vm9, %v1883_v22, %v963_v57  ;;  %v982_v41 = vsel %vm873_vm9, %v1888_v61, %v964_v38  ;;  %v925_v42 = vpop.permute.xlu0 %924  ;;  %v983_v22 = vsel %vm873_vm9, %v1892_v10, %v965_v46  ;;  %v694_v10 = vmul.f32 15.0, %v1385_v28 }
 0x252   :  { %v999_v49 = vsel %vm872_vm10, 1.0, %v981_v25  ;;  %v1000_v51 = vsel %vm872_vm10, 1.0, %v982_v41  ;;  %v966_v34 = vsel %vm874_vm8, %v925_v42, 0.0  ;;  %v1001_v3 = vsel %vm872_vm10, 1.0, %v983_v22 }
 0x253   :  { %1013 = vxpose.xlu0.b32.cont [4/16] (narrow) %v996_v54, 8  ;;  %v984_v61 = vsel %vm873_vm9, %v1897_v58, %v966_v34  ;;  %v710_v15 = vceil.f32 %v694_v10 }
 0x254   :  { %v1002_v47 = vsel %vm872_vm10, 1.0, %v984_v61 }
 0x255   :  { %v935_v55 = vpop.permute.xlu0 %934  ;;  %v1292_v6 = vtrunc.f32 %v710_v15 }
 0x256   :  { %v968_v60 = vsel %vm874_vm8, %v935_v55, 0.0 }
 0x257   :  { %1014 = vxpose.xlu0.b32.cont [5/16] (narrow) %v997_v0, 8  ;;  %v1293_v48 = vcvt.f32.s32 %v1292_v6  ;;  %v986_v19 = vsel %vm873_vm9, %v1900_v36, %v968_v60 }
 0x258   :  { %v1004_v37 = vsel %vm872_vm10, 1.0, %v986_v19 }
 0x259   :  { %v940_v59 = vpop.permute.xlu0 %939  ;;  %v1154_v26 = vadd.s32 4294967295, %v1293_v48 }
 0x25a   :  { %v969_v2 = vsel %vm874_vm8, %v940_v59, 0.0 }
 0x25b   :  { %1015 = vxpose.xlu0.b32.cont [6/16] (narrow) %v998_v56, 8  ;;  %vm772_vm11 = vcmp.gt.s32.totalorder %v1154_v26, 0 }
 0x25c   :  { %v773_v40 = vsel %vm772_vm11, %v1154_v26, 0 }
 0x25d   :  { %v945_v52 = vpop.permute.xlu0 %944  ;;  %vm804_vm12 = vcmp.lt.s32.totalorder %v773_v40, 14 }
 0x25e   :  { %v970_v62 = vsel %vm874_vm8, %v945_v52, 0.0  ;;  %v805_v23 = vsel %vm804_vm12, %v773_v40, 14 }
 0x25f   :  { %1016 = vxpose.xlu0.b32.cont [7/16] (narrow) %v999_v49, 8  ;;  %v988_v53 = vsel %vm873_vm9, %v1923_v7, %v970_v62  ;;  %vm838_vm15 = vcmp.eq.s32.totalorder %v1546_v33, %v805_v23 }
 0x260   :  { %v1006_v31 = vsel %vm872_vm10, 1.0, %v988_v53 }
 0x261   :  { %v950_v36 = vpop.permute.xlu0 %949 }
 0x263   :  { %1017 = vxpose.xlu0.b32.cont [8/16] (narrow) %v1000_v51, 8 }
 0x267   :  { %1018 = vxpose.xlu0.b32.cont [9/16] (narrow) %v1001_v3, 8 }
 0x26b   :  { %1019 = vxpose.xlu0.b32.cont [10/16] (narrow) %v1002_v47, 8 }
 0x27f   :  { %v515_v16 = vpop.xlane.xlu1 %514 }
 0x280   :  { %1386 = vrcp.f32 %v515_v16 }
 0x283   :  { %v930_v63 = vpop.permute.xlu1 %929 }
 0x284   :  { %v967_v58 = vsel %vm874_vm8, %v930_v63, 0.0 }
 0x285   :  { %v985_v11 = vsel %vm873_vm9, %v1915_v4, %v967_v58  ;;  %v987_v4 = vsel %vm873_vm9, %v1920_v18, %v969_v2  ;;  %v971_v18 = vsel %vm874_vm8, %v950_v36, 0.0 }
 0x286   :  { %v1003_v17 = vsel %vm872_vm10, 1.0, %v985_v11  ;;  %v1005_v35 = vsel %vm872_vm10, 1.0, %v987_v4  ;;  %v989_v45 = vsel %vm873_vm9, %v1385_v28, %v971_v18 }
 0x287   :  { %1020 = vxpose.xlu0.b32.cont [11/16] (narrow) %v1003_v17, 8  ;;  %v955_v24 = vpop.permute.xlu1 %954  ;;  %v1007_v8 = vsel %vm872_vm10, 1.0, %v989_v45 }
 0x288   :  { %v972_v7 = vsel %vm874_vm8, %v955_v24, 0.0 }
 0x28a   :  { %v1387_v32 = vpop.eup %1386 }
 0x28b   :  { %1021 = vxpose.xlu0.b32.cont [12/16] (narrow) %v1004_v37, 8  ;;  %v695_v21 = vmul.f32 15.0, %v1387_v32  ;;  %v990_v14 = vsel %vm873_vm9, %v1387_v32, %v972_v7 }
 0x28c   :  { %v1008_v54 = vsel %vm872_vm10, 1.0, %v990_v14 }
 0x28d   :  { %v711_v1 = vceil.f32 %v695_v21 }
 0x28f   :  { %1022 = vxpose.xlu0.b32.cont [13/16] (narrow) %v1005_v35, 8  ;;  %v1294_v5 = vtrunc.f32 %v711_v1 }
 0x291   :  { %v1295_v27 = vcvt.f32.s32 %v1294_v5 }
 0x293   :  { %1023 = vxpose.xlu0.b32.cont [14/16] (narrow) %v1006_v31, 8  ;;  %v1155_v50 = vadd.s32 4294967295, %v1295_v27 }
 0x295   :  { %vm774_vm13 = vcmp.gt.s32.totalorder %v1155_v50, 0 }
 0x296   :  { %v775_v44 = vsel %vm774_vm13, %v1155_v50, 0 }
 0x297   :  { %1024 = vxpose.xlu0.b32.cont [15/16] (narrow) %v1007_v8, 8  ;;  %vm806_vm14 = vcmp.lt.s32.totalorder %v775_v44, 14 }
 0x298   :  { %v807_v43 = vsel %vm806_vm14, %v775_v44, 14 }
 0x299   :  { %vm839_vm1 = vcmp.eq.s32.totalorder %v1546_v33, %v807_v43 }
 0x29a   :  { %vm1262_vm2 = vmpackc.low %vm839_vm1, %vm838_vm15 }
 0x29b   :  { %1263 = vmatpush3.bf16.msk.msra.mxu0 %vm1262_vm2, %v1415_v30  ;;  %1025 = vxpose.xlu0.b32.end [16/16] (narrow) %v1008_v54, 8 }
 0x2df   :  { %v1026_v20 = vpop.trf.xlu0 }
 0x2e0   :  { %1238 = vmatmul.mubr.f32.vlgmr.msra.gmra.mrb[0].mxu0 %v1026_v20 }
 0x3b3   :  { %v1108_v9 = vpop.f32.mrb[0].mxu0 }
 0x3b4   :  { %v1239_v12 = vpop.f32.mrb[1].mxu0  ;;  %1113 = vst [vmem:[#allocation2] sm:$0xff] %v1108_v9 }
 0x3b5   :  { %1400 = shalt.err (!%p1397_p4)
}
 0x3b6   :  { %s1401_s22 = scalar_lea.hbm %s2160_s2, 128 }
 0x3b7   :  { %p1402_p5 = scmp.ne.s32.totalorder %s2160_s2, %s1401_s22  ;;  %p1405_p6 = scmp.lt.u32.totalorder %s1401_s22, %s2160_s2 }
 0x3b9   :  { %p1407_p7 = pnand %p1405_p6, %p1402_p5 }
 0x3bb   :  { %1410 = shalt.err (!%p1407_p7)
}
 0x3bc   :  { %1123 = dma.vmem_to_hbm [thread:$0]  %s1121_s18, 128, %s2160_s2, [#allocation3]  }
 0x3bd   :  { %1411 = dma.done.wait [#allocation3], 128  }
 0x3be   :  { %1412 = vsyncadd [#allocation3], 4294967168 }
 0x3bf   :  { %1127 = vsyncpa [#allocation3], 1 }

</bundles_post_ra>
